<compile_context>
chip_gen: v5e
topology: v5e:2x2
jax: 0.10.0
libtpu: 0.0.40
codegen_flags: <defaults>
</compile_context>

<pallas_src>
import math
import functools

import jax
import jax.numpy as jnp
from jax.experimental import pallas as pl
from jax.experimental.pallas import tpu as pltpu


def _round_up(x, m):
    return (x + m - 1) // m * m


def vit_attention_kernel(xq_ref, xk_ref, xv_ref,
                         wqkv_ref, bqkv_ref, wo_ref, bo_ref,
                         o_ref, acc_ref, kc_ref, vc_ref,
                         *, scaling, seq_len):
    """One (query-tile, head) grid step of fused ViT attention.

    xq_ref   : (tq, E)     bf16  query rows for this tile
    xk_ref   : (Sp, E)     bf16  full key input   (resident: constant index_map)
    xv_ref   : (Sp, E)     bf16  full value input (resident)
    wqkv_ref : (3, 1, E, D) bf16 per-head Q/K/V projection column slices
    bqkv_ref : (3, 1, 1, D) f32  per-head Q/K/V biases
    wo_ref   : (1, D, E)   bf16  per-head output-projection row slice
    bo_ref   : (1, E)      f32   output-projection bias
    o_ref    : (tq, E)           output tile (head axis is a reduction)
    acc_ref  : (tq, E)     f32   VMEM accumulator for the fused out-projection
    kc_ref   : (H, Sp, D)  bf16  per-head K projection cache (filled at i==0)
    vc_ref   : (H, Sp, D)  bf16  per-head V projection cache (filled at i==0)
    """
    i = pl.program_id(0)
    h = pl.program_id(1)

    @pl.when(h == 0)
    def _():
        acc_ref[...] = jnp.zeros_like(acc_ref)

    # K/V projections depend only on the head (not on the query tile): compute
    # them once, on the first query tile, and cache them in VMEM.
    @pl.when(i == 0)
    def _():
        xk = xk_ref[...]
        xv = xv_ref[...]
        k = jnp.dot(xk, wqkv_ref[1, 0], preferred_element_type=jnp.float32) + bqkv_ref[1, 0]
        v = jnp.dot(xv, wqkv_ref[2, 0], preferred_element_type=jnp.float32) + bqkv_ref[2, 0]
        kc_ref[h] = k.astype(kc_ref.dtype)
        vc_ref[h] = v.astype(vc_ref.dtype)

    # Per-head Q projection for this query tile: bf16 MXU, f32 accumulation.
    xq = xq_ref[...]
    q = jnp.dot(xq, wqkv_ref[0, 0], preferred_element_type=jnp.float32) + bqkv_ref[0, 0]
    # Fold 1/sqrt(D) into Q (a (tq, D) pass instead of a (tq, Sp) pass).
    q = (q * scaling).astype(jnp.bfloat16)

    k = kc_ref[h]                                   # (Sp, D) bf16
    v = vc_ref[h]                                   # (Sp, D) bf16

    # scores = Q @ K^T -> (tq, Sp)
    scores = jax.lax.dot_general(
        q, k, dimension_numbers=(((1,), (1,)), ((), ())),
        preferred_element_type=jnp.float32)

    kv_len = scores.shape[1]
    if seq_len < kv_len:  # trace-time branch: mask zero-padded key rows
        col = jax.lax.broadcasted_iota(jnp.int32, scores.shape, 1)
        scores = jnp.where(col < seq_len, scores, jnp.float32(-1e30))

    # Numerically stable softmax; reciprocal goes to the EUP slot.
    m = jnp.max(scores, axis=-1, keepdims=True)
    e = jnp.exp(scores - m)
    denom = jnp.sum(e, axis=-1, keepdims=True)
    probs = (e * pl.reciprocal(denom, approx=True)).astype(jnp.bfloat16)

    # context = P @ V -> (tq, D); per-head slice of the fused output projection.
    ctx = jnp.dot(probs, v, preferred_element_type=jnp.float32)
    acc_ref[...] += jnp.dot(ctx.astype(jnp.bfloat16), wo_ref[0],
                            preferred_element_type=jnp.float32)

    @pl.when(h == pl.num_programs(1) - 1)
    def _():
        o_ref[...] = (acc_ref[...] + bo_ref[...]).astype(o_ref.dtype)


def vit_attention(query, key, value, params, num_heads, *, q_tile=256):
    """query/key/value: (S, 1, E); params: torch-Linear-style (out,in) weights + biases."""
    S, B, E = query.shape
    assert B == 1, "module semantics require batch dim == 1 (un-batch_first, N=1)"
    H = num_heads
    assert E % H == 0
    D = E // H
    scaling = 1.0 / math.sqrt(D)

    wq, bq, wk, bk, wv, bv, wo, bo = params

    # torch Linear: y = x @ W.T + b with W of shape (out, in).
    # Split W.T's output columns per head: (E, H, D) -> (H, E, D), so Q_h = x @ wq_h[h].
    def qkv_w(w):
        return jnp.transpose(jnp.reshape(w.T, (E, H, D)), (1, 0, 2))

    def qkv_b(b):
        return jnp.reshape(b, (H, 1, D))

    wqkv = jnp.stack([qkv_w(wq), qkv_w(wk), qkv_w(wv)], axis=0).astype(jnp.bfloat16)   # (3,H,E,D)
    bqkv = jnp.stack([qkv_b(bq), qkv_b(bk), qkv_b(bv)], axis=0).astype(jnp.float32)    # (3,H,1,D)
    # Output projection: y = ctx @ Wo.T; Wo.T is (H*D, E) -> per-head rows (H, D, E).
    wo_h = jnp.reshape(wo.T, (H, D, E)).astype(jnp.bfloat16)
    bo_r = jnp.reshape(bo, (1, E)).astype(jnp.float32)

    # Pad the sequence to a multiple of the (8-aligned) query tile.
    tq = min(_round_up(q_tile, 8), _round_up(S, 8))
    Sp = _round_up(S, tq)

    def pad_seq(x):  # (S, 1, E) -> (Sp, E) bf16
        x2 = x[:, 0, :]
        if Sp != S:
            x2 = jnp.pad(x2, ((0, Sp - S), (0, 0)))
        return x2.astype(jnp.bfloat16)

    xq_p, xk_p, xv_p = pad_seq(query), pad_seq(key), pad_seq(value)

    grid = (Sp // tq, H)
    kernel = functools.partial(vit_attention_kernel, scaling=scaling, seq_len=S)

    out = pl.pallas_call(
        kernel,
        out_shape=jax.ShapeDtypeStruct((Sp, E), query.dtype),
        grid_spec=pltpu.PrefetchScalarGridSpec(
            num_scalar_prefetch=0,
            grid=grid,
            in_specs=[
                pl.BlockSpec((tq, E), lambda i, h: (i, 0)),          # xq (per q-tile)
                pl.BlockSpec((Sp, E), lambda i, h: (0, 0)),          # xk (resident)
                pl.BlockSpec((Sp, E), lambda i, h: (0, 0)),          # xv (resident)
                pl.BlockSpec((3, 1, E, D), lambda i, h: (0, h, 0, 0)),  # wqkv_h
                pl.BlockSpec((3, 1, 1, D), lambda i, h: (0, h, 0, 0)),  # bqkv_h
                pl.BlockSpec((1, D, E), lambda i, h: (h, 0, 0)),     # wo_h
                pl.BlockSpec((1, E), lambda i, h: (0, 0)),           # bo
            ],
            out_specs=pl.BlockSpec((tq, E), lambda i, h: (i, 0)),
            scratch_shapes=[
                pltpu.VMEM((tq, E), jnp.float32),       # out-projection accumulator
                pltpu.VMEM((H, Sp, D), jnp.bfloat16),   # K projection cache
                pltpu.VMEM((H, Sp, D), jnp.bfloat16),   # V projection cache
            ],
        ),
        compiler_params=pltpu.CompilerParams(
            # Both axes "arbitrary": the head axis is a reduction into acc_ref,
            # and the query-tile axis must run sequentially so the K/V caches
            # (filled at i == 0) are valid for later tiles.
            dimension_semantics=("arbitrary", "arbitrary"),
        ),
    )(xq_p, xk_p, xv_p, wqkv, bqkv, wo_h, bo_r)

    # Restore the module's output shape (S, 1, E).
    return out[:S].reshape(S, 1, E)


def vit_attention_reference(query, key, value, params, num_heads):
    """Pure-JAX f32 reference mirroring forward_vit (eval / no dropout)."""
    wq, bq, wk, bk, wv, bv, wo, bo = params
    S, B, E = query.shape
    D = E // num_heads
    Q = query[:, 0, :] @ wq.T + bq
    K = key[:, 0, :] @ wk.T + bk
    V = value[:, 0, :] @ wv.T + bv
    Qh = Q.reshape(S, num_heads, D).transpose(1, 0, 2)   # (H, S, D)
    Kh = K.reshape(S, num_heads, D).transpose(1, 0, 2)
    Vh = V.reshape(S, num_heads, D).transpose(1, 0, 2)
    scores = (Qh @ Kh.transpose(0, 2, 1)) * (1.0 / math.sqrt(D))
    probs = jax.nn.softmax(scores, axis=-1)
    ctx = (probs @ Vh).transpose(1, 0, 2).reshape(S, 1, E)
    return ctx @ wo.T + bo


if __name__ == "__main__":
    # TODO(synk): attn_dropout / proj_dropout are identity (eval mode); training-mode
    # dropout masks are not implemented.
    E, H = 32, 4  # embed_dim=32, num_heads=4 (head_dim=8), batch=1
    key0 = jax.random.PRNGKey(0)
    ks = jax.random.split(key0, 12)

    scale = 0.1
    wq = scale * jax.random.normal(ks[0], (E, E), jnp.float32)
    wk = scale * jax.random.normal(ks[1], (E, E), jnp.float32)
    wv = scale * jax.random.normal(ks[2], (E, E), jnp.float32)
    wo = scale * jax.random.normal(ks[3], (E, E), jnp.float32)
    bq = scale * jax.random.normal(ks[4], (E,), jnp.float32)
    bk = scale * jax.random.normal(ks[5], (E,), jnp.float32)
    bv = scale * jax.random.normal(ks[6], (E,), jnp.float32)
    bo = scale * jax.random.normal(ks[7], (E,), jnp.float32)
    params = (wq, bq, wk, bk, wv, bv, wo, bo)

    # bf16 MXU operands + approx reciprocal loosen tolerance vs the f32 reference.
    TOL = 2e-2

    # Test 1: aligned sequence (S = 8, single query tile, no padding path).
    S = 8
    q = jax.random.normal(ks[8], (S, 1, E), jnp.float32)
    k = jax.random.normal(ks[9], (S, 1, E), jnp.float32)
    v = jax.random.normal(ks[10], (S, 1, E), jnp.float32)
    out = jax.block_until_ready(vit_attention(q, k, v, params, num_heads=H))
    ref = vit_attention_reference(q, k, v, params, num_heads=H)
    assert out.shape == (S, 1, E)
    err = float(jnp.max(jnp.abs(out - ref)))
    assert err < TOL, f"mismatch vs reference (aligned): max abs err {err}"

    # Test 2: unaligned sequence (S = 12 -> padded to 16, exercises the KV mask).
    S2 = 12
    q2 = jax.random.normal(ks[11], (S2, 1, E), jnp.float32)
    k2 = jax.random.normal(ks[8], (S2, 1, E), jnp.float32)
    v2 = jax.random.normal(ks[9], (S2, 1, E), jnp.float32)
    out2 = jax.block_until_ready(vit_attention(q2, k2, v2, params, num_heads=H))
    ref2 = vit_attention_reference(q2, k2, v2, params, num_heads=H)
    assert out2.shape == (S2, 1, E)
    err2 = float(jnp.max(jnp.abs(out2 - ref2)))
    assert err2 < TOL, f"mismatch vs reference (padded): max abs err {err2}"

    # Test 3: multiple query tiles (S = 40, q_tile = 16 -> grid (3, H));
    # exercises the cross-tile K/V cache and the padded-key mask together.
    S3 = 40
    q3 = jax.random.normal(ks[10], (S3, 1, E), jnp.float32)
    k3 = jax.random.normal(ks[11], (S3, 1, E), jnp.float32)
    v3 = jax.random.normal(ks[8], (S3, 1, E), jnp.float32)
    out3 = jax.block_until_ready(
        vit_attention(q3, k3, v3, params, num_heads=H, q_tile=16))
    ref3 = vit_attention_reference(q3, k3, v3, params, num_heads=H)
    assert out3.shape == (S3, 1, E)
    err3 = float(jnp.max(jnp.abs(out3 - ref3)))
    assert err3 < TOL, f"mismatch vs reference (multi-tile): max abs err {err3}"

    print("KERNEL_OK")
</pallas_src>

<mosaic_0001>
module attributes {stable_mosaic.version = 11 : i64} {
  func.func @vit_attention_kernel(%arg0: i32, %arg1: i32, %arg2: memref<8x32xbf16, #tpu.memory_space<vmem>>, %arg3: memref<8x32xbf16, #tpu.memory_space<vmem>>, %arg4: memref<8x32xbf16, #tpu.memory_space<vmem>>, %arg5: memref<3x1x32x8xbf16, #tpu.memory_space<vmem>>, %arg6: memref<3x1x1x8xf32, #tpu.memory_space<vmem>>, %arg7: memref<1x8x32xbf16, #tpu.memory_space<vmem>>, %arg8: memref<1x32xf32, #tpu.memory_space<vmem>>, %arg9: memref<8x32xf32, #tpu.memory_space<vmem>>, %arg10: memref<8x32xf32, #tpu.memory_space<vmem>>, %arg11: memref<4x8x8xbf16, #tpu.memory_space<vmem>>, %arg12: memref<4x8x8xbf16, #tpu.memory_space<vmem>>) attributes {dimension_semantics = [#tpu.dimension_semantics<arbitrary>, #tpu.dimension_semantics<arbitrary>], iteration_bounds = array<i64: 1, 4>, scalar_prefetch = 0 : i64, scratch_operands = 3 : i64, tpu.core_type = #tpu.core_type<tc>, window_params = [{transform_indices = @transform_0, window_bounds = array<i64: 8, 32>}, {pipeline_mode = #tpu.pipeline_mode<synchronous>, transform_indices = @transform_1, window_bounds = array<i64: 8, 32>}, {pipeline_mode = #tpu.pipeline_mode<synchronous>, transform_indices = @transform_2, window_bounds = array<i64: 8, 32>}, {transform_indices = @transform_3, window_bounds = array<i64: 3, 1, 32, 8>}, {transform_indices = @transform_4, window_bounds = array<i64: 3, 1, 1, 8>}, {transform_indices = @transform_5, window_bounds = array<i64: 1, 8, 32>}, {pipeline_mode = #tpu.pipeline_mode<synchronous>, transform_indices = @transform_6, window_bounds = array<i64: 1, 32>}, {transform_indices = @transform_7, window_bounds = array<i64: 8, 32>}]} {
    %c0_i32 = arith.constant 0 : i32
    %0 = arith.cmpi eq, %arg1, %c0_i32 : i32
    %1 = arith.extui %0 : i1 to i32
    %c0_i32_0 = arith.constant 0 : i32
    %2 = arith.cmpi ne, %1, %c0_i32_0 : i32
    scf.if %2 {
      %cst_30 = arith.constant 0.000000e+00 : f32
      %46 = vector.broadcast %cst_30 : f32 to vector<8x32xf32>
      %c0_31 = arith.constant 0 : index
      %c0_32 = arith.constant 0 : index
      %47 = vector.load %arg10[%c0_31, %c0_32] : memref<8x32xf32, #tpu.memory_space<vmem>>, vector<8x32xf32>
      tpu.vector_store %arg10[%c0_31, %c0_32], %46 {strides = array<i32>} : memref<8x32xf32, #tpu.memory_space<vmem>>, vector<8x32xf32>,
    } else {
    }
    %c0_i32_1 = arith.constant 0 : i32
    %3 = arith.cmpi eq, %arg0, %c0_i32_1 : i32
    %4 = arith.extui %3 : i1 to i32
    %c0_i32_2 = arith.constant 0 : i32
    %5 = arith.cmpi ne, %4, %c0_i32_2 : i32
    scf.if %5 {
      %c0_30 = arith.constant 0 : index
      %c0_31 = arith.constant 0 : index
      %46 = vector.load %arg3[%c0_30, %c0_31] : memref<8x32xbf16, #tpu.memory_space<vmem>>, vector<8x32xbf16>
      %c0_32 = arith.constant 0 : index
      %c0_33 = arith.constant 0 : index
      %47 = vector.load %arg4[%c0_32, %c0_33] : memref<8x32xbf16, #tpu.memory_space<vmem>>, vector<8x32xbf16>
      %c1 = arith.constant 1 : index
      %c0_34 = arith.constant 0 : index
      %c0_35 = arith.constant 0 : index
      %c0_36 = arith.constant 0 : index
      %48 = vector.load %arg5[%c1, %c0_34, %c0_35, %c0_36] : memref<3x1x32x8xbf16, #tpu.memory_space<vmem>>, vector<1x1x32x8xbf16>
      %49 = vector.shape_cast %48 : vector<1x1x32x8xbf16> to vector<32x8xbf16>
      %cst_37 = arith.constant dense<0.000000e+00> : vector<8x8xf32>
      %50 = tpu.matmul %46, %49, %cst_37 {dimension_numbers = #tpu.dot_dimension_numbers<[1], [0], [0], [1], [0, 0, 1, 1], [], []>} : vector<8x32xbf16>, vector<32x8xbf16>, vector<8x8xf32> -> vector<8x8xf32>
      %c1_38 = arith.constant 1 : index
      %c0_39 = arith.constant 0 : index
      %c0_40 = arith.constant 0 : index
      %c0_41 = arith.constant 0 : index
      %51 = vector.load %arg6[%c1_38, %c0_39, %c0_40, %c0_41] : memref<3x1x1x8xf32, #tpu.memory_space<vmem>>, vector<1x1x1x8xf32>
      %52 = vector.shape_cast %51 : vector<1x1x1x8xf32> to vector<1x8xf32>
      %53 = vector.broadcast %52 : vector<1x8xf32> to vector<8x8xf32>
      %54 = arith.addf %50, %53 : vector<8x8xf32>
      %c2 = arith.constant 2 : index
      %c0_42 = arith.constant 0 : index
      %c0_43 = arith.constant 0 : index
      %c0_44 = arith.constant 0 : index
      %55 = vector.load %arg5[%c2, %c0_42, %c0_43, %c0_44] : memref<3x1x32x8xbf16, #tpu.memory_space<vmem>>, vector<1x1x32x8xbf16>
      %56 = vector.shape_cast %55 : vector<1x1x32x8xbf16> to vector<32x8xbf16>
      %cst_45 = arith.constant dense<0.000000e+00> : vector<8x8xf32>
      %57 = tpu.matmul %47, %56, %cst_45 {dimension_numbers = #tpu.dot_dimension_numbers<[1], [0], [0], [1], [0, 0, 1, 1], [], []>} : vector<8x32xbf16>, vector<32x8xbf16>, vector<8x8xf32> -> vector<8x8xf32>
      %c2_46 = arith.constant 2 : index
      %c0_47 = arith.constant 0 : index
      %c0_48 = arith.constant 0 : index
      %c0_49 = arith.constant 0 : index
      %58 = vector.load %arg6[%c2_46, %c0_47, %c0_48, %c0_49] : memref<3x1x1x8xf32, #tpu.memory_space<vmem>>, vector<1x1x1x8xf32>
      %59 = vector.shape_cast %58 : vector<1x1x1x8xf32> to vector<1x8xf32>
      %60 = vector.broadcast %59 : vector<1x8xf32> to vector<8x8xf32>
      %61 = arith.addf %57, %60 : vector<8x8xf32>
      %62 = arith.truncf %54 : vector<8x8xf32> to vector<8x8xbf16>
      %63 = arith.index_cast %arg1 : i32 to index
      %c0_50 = arith.constant 0 : index
      %c0_51 = arith.constant 0 : index
      %64 = vector.load %arg11[%63, %c0_50, %c0_51] : memref<4x8x8xbf16, #tpu.memory_space<vmem>>, vector<1x8x8xbf16>
      %65 = vector.shape_cast %64 : vector<1x8x8xbf16> to vector<8x8xbf16>
      %66 = vector.shape_cast %62 : vector<8x8xbf16> to vector<1x8x8xbf16>
      tpu.vector_store %arg11[%63, %c0_50, %c0_51], %66 {strides = array<i32>} : memref<4x8x8xbf16, #tpu.memory_space<vmem>>, vector<1x8x8xbf16>,
      %67 = arith.truncf %61 : vector<8x8xf32> to vector<8x8xbf16>
      %68 = arith.index_cast %arg1 : i32 to index
      %c0_52 = arith.constant 0 : index
      %c0_53 = arith.constant 0 : index
      %69 = vector.load %arg12[%68, %c0_52, %c0_53] : memref<4x8x8xbf16, #tpu.memory_space<vmem>>, vector<1x8x8xbf16>
      %70 = vector.shape_cast %69 : vector<1x8x8xbf16> to vector<8x8xbf16>
      %71 = vector.shape_cast %67 : vector<8x8xbf16> to vector<1x8x8xbf16>
      tpu.vector_store %arg12[%68, %c0_52, %c0_53], %71 {strides = array<i32>} : memref<4x8x8xbf16, #tpu.memory_space<vmem>>, vector<1x8x8xbf16>,
    } else {
    }
    %c0 = arith.constant 0 : index
    %c0_3 = arith.constant 0 : index
    %6 = vector.load %arg2[%c0, %c0_3] : memref<8x32xbf16, #tpu.memory_space<vmem>>, vector<8x32xbf16>
    %c0_4 = arith.constant 0 : index
    %c0_5 = arith.constant 0 : index
    %c0_6 = arith.constant 0 : index
    %c0_7 = arith.constant 0 : index
    %7 = vector.load %arg5[%c0_4, %c0_5, %c0_6, %c0_7] : memref<3x1x32x8xbf16, #tpu.memory_space<vmem>>, vector<1x1x32x8xbf16>
    %8 = vector.shape_cast %7 : vector<1x1x32x8xbf16> to vector<32x8xbf16>
    %cst = arith.constant dense<0.000000e+00> : vector<8x8xf32>
    %9 = tpu.matmul %6, %8, %cst {dimension_numbers = #tpu.dot_dimension_numbers<[1], [0], [0], [1], [0, 0, 1, 1], [], []>} : vector<8x32xbf16>, vector<32x8xbf16>, vector<8x8xf32> -> vector<8x8xf32>
    %c0_8 = arith.constant 0 : index
    %c0_9 = arith.constant 0 : index
    %c0_10 = arith.constant 0 : index
    %c0_11 = arith.constant 0 : index
    %10 = vector.load %arg6[%c0_8, %c0_9, %c0_10, %c0_11] : memref<3x1x1x8xf32, #tpu.memory_space<vmem>>, vector<1x1x1x8xf32>
    %11 = vector.shape_cast %10 : vector<1x1x1x8xf32> to vector<1x8xf32>
    %12 = vector.broadcast %11 : vector<1x8xf32> to vector<8x8xf32>
    %13 = arith.addf %9, %12 : vector<8x8xf32>
    %cst_12 = arith.constant 0.353553385 : f32
    %14 = vector.broadcast %cst_12 : f32 to vector<8x8xf32>
    %15 = arith.mulf %13, %14 : vector<8x8xf32>
    %16 = arith.truncf %15 : vector<8x8xf32> to vector<8x8xbf16>
    %17 = arith.index_cast %arg1 : i32 to index
    %c0_13 = arith.constant 0 : index
    %c0_14 = arith.constant 0 : index
    %18 = vector.load %arg11[%17, %c0_13, %c0_14] : memref<4x8x8xbf16, #tpu.memory_space<vmem>>, vector<1x8x8xbf16>
    %19 = vector.shape_cast %18 : vector<1x8x8xbf16> to vector<8x8xbf16>
    %20 = arith.index_cast %arg1 : i32 to index
    %c0_15 = arith.constant 0 : index
    %c0_16 = arith.constant 0 : index
    %21 = vector.load %arg12[%20, %c0_15, %c0_16] : memref<4x8x8xbf16, #tpu.memory_space<vmem>>, vector<1x8x8xbf16>
    %22 = vector.shape_cast %21 : vector<1x8x8xbf16> to vector<8x8xbf16>
    %cst_17 = arith.constant dense<0.000000e+00> : vector<8x8xf32>
    %23 = tpu.matmul %16, %19, %cst_17 {dimension_numbers = #tpu.dot_dimension_numbers<[1], [1], [0], [0], [0, 0, 1, 0], [], []>} : vector<8x8xbf16>, vector<8x8xbf16>, vector<8x8xf32> -> vector<8x8xf32>
    %cst_18 = arith.constant dense<0xFF800000> : vector<8xf32>
    %24 = vector.multi_reduction <maximumf>, %23, %cst_18 [1] : vector<8x8xf32> to vector<8xf32>
    %25 = vector.shape_cast %24 : vector<8xf32> to vector<8x1xf32>
    %26 = vector.broadcast %25 : vector<8x1xf32> to vector<8x8xf32>
    %27 = arith.subf %23, %26 : vector<8x8xf32>
    %28 = math.exp %27 : vector<8x8xf32>
    %cst_19 = arith.constant dense<0.000000e+00> : vector<8xf32>
    %29 = vector.multi_reduction <add>, %28, %cst_19 [1] : vector<8x8xf32> to vector<8xf32>
    %30 = vector.shape_cast %29 : vector<8xf32> to vector<8x1xf32>
    %31 = tpu.reciprocal %30 {approx = true} : vector<8x1xf32> -> vector<8x1xf32>
    %32 = vector.broadcast %31 : vector<8x1xf32> to vector<8x8xf32>
    %33 = arith.mulf %28, %32 : vector<8x8xf32>
    %34 = arith.truncf %33 : vector<8x8xf32> to vector<8x8xbf16>
    %cst_20 = arith.constant dense<0.000000e+00> : vector<8x8xf32>
    %35 = tpu.matmul %34, %22, %cst_20 {dimension_numbers = #tpu.dot_dimension_numbers<[1], [0], [0], [1], [0, 0, 1, 1], [], []>} : vector<8x8xbf16>, vector<8x8xbf16>, vector<8x8xf32> -> vector<8x8xf32>
    %c0_21 = arith.constant 0 : index
    %c0_22 = arith.constant 0 : index
    %36 = vector.load %arg10[%c0_21, %c0_22] : memref<8x32xf32, #tpu.memory_space<vmem>>, vector<8x32xf32>
    %37 = arith.truncf %35 : vector<8x8xf32> to vector<8x8xbf16>
    %c0_23 = arith.constant 0 : index
    %c0_24 = arith.constant 0 : index
    %c0_25 = arith.constant 0 : index
    %38 = vector.load %arg7[%c0_23, %c0_24, %c0_25] : memref<1x8x32xbf16, #tpu.memory_space<vmem>>, vector<1x8x32xbf16>
    %39 = vector.shape_cast %38 : vector<1x8x32xbf16> to vector<8x32xbf16>
    %cst_26 = arith.constant dense<0.000000e+00> : vector<8x32xf32>
    %40 = tpu.matmul %37, %39, %cst_26 {dimension_numbers = #tpu.dot_dimension_numbers<[1], [0], [0], [1], [0, 0, 1, 1], [], []>} : vector<8x8xbf16>, vector<8x32xbf16>, vector<8x32xf32> -> vector<8x32xf32>
    %41 = arith.addf %36, %40 : vector<8x32xf32>
    %c0_27 = arith.constant 0 : index
    %c0_28 = arith.constant 0 : index
    %42 = vector.load %arg10[%c0_27, %c0_28] : memref<8x32xf32, #tpu.memory_space<vmem>>, vector<8x32xf32>
    tpu.vector_store %arg10[%c0_27, %c0_28], %41 {strides = array<i32>} : memref<8x32xf32, #tpu.memory_space<vmem>>, vector<8x32xf32>,
    %c3_i32 = arith.constant 3 : i32
    %43 = arith.cmpi eq, %arg1, %c3_i32 : i32
    %44 = arith.extui %43 : i1 to i32
    %c0_i32_29 = arith.constant 0 : i32
    %45 = arith.cmpi ne, %44, %c0_i32_29 : i32
    scf.if %45 {
      %c0_30 = arith.constant 0 : index
      %c0_31 = arith.constant 0 : index
      %46 = vector.load %arg10[%c0_30, %c0_31] : memref<8x32xf32, #tpu.memory_space<vmem>>, vector<8x32xf32>
      %c0_32 = arith.constant 0 : index
      %c0_33 = arith.constant 0 : index
      %47 = vector.load %arg8[%c0_32, %c0_33] : memref<1x32xf32, #tpu.memory_space<vmem>>, vector<1x32xf32>
      %48 = vector.broadcast %47 : vector<1x32xf32> to vector<8x32xf32>
      %49 = arith.addf %46, %48 : vector<8x32xf32>
      %c0_34 = arith.constant 0 : index
      %c0_35 = arith.constant 0 : index
      %50 = vector.load %arg9[%c0_34, %c0_35] : memref<8x32xf32, #tpu.memory_space<vmem>>, vector<8x32xf32>
      tpu.vector_store %arg9[%c0_34, %c0_35], %49 {strides = array<i32>} : memref<8x32xf32, #tpu.memory_space<vmem>>, vector<8x32xf32>,
    } else {
    }
    return
  }
  func.func @transform_0(%arg0: i32, %arg1: i32) -> (i32, i32) {
    %c0_i32 = arith.constant 0 : i32
    %c0_i32_0 = arith.constant 0 : i32
    return %arg0, %c0_i32 : i32, i32
  }
  func.func @transform_1(%arg0: i32, %arg1: i32) -> (i32, i32) {
    %c0_i32 = arith.constant 0 : i32
    %c0_i32_0 = arith.constant 0 : i32
    %c0_i32_1 = arith.constant 0 : i32
    return %c0_i32, %c0_i32_0 : i32, i32
  }
  func.func @transform_2(%arg0: i32, %arg1: i32) -> (i32, i32) {
    %c0_i32 = arith.constant 0 : i32
    %c0_i32_0 = arith.constant 0 : i32
    %c0_i32_1 = arith.constant 0 : i32
    return %c0_i32, %c0_i32_0 : i32, i32
  }
  func.func @transform_3(%arg0: i32, %arg1: i32) -> (i32, i32, i32, i32) {
    %c0_i32 = arith.constant 0 : i32
    %c0_i32_0 = arith.constant 0 : i32
    %c0_i32_1 = arith.constant 0 : i32
    %c0_i32_2 = arith.constant 0 : i32
    return %c0_i32, %arg1, %c0_i32_0, %c0_i32_1 : i32, i32, i32, i32
  }
  func.func @transform_4(%arg0: i32, %arg1: i32) -> (i32, i32, i32, i32) {
    %c0_i32 = arith.constant 0 : i32
    %c0_i32_0 = arith.constant 0 : i32
    %c0_i32_1 = arith.constant 0 : i32
    %c0_i32_2 = arith.constant 0 : i32
    return %c0_i32, %arg1, %c0_i32_0, %c0_i32_1 : i32, i32, i32, i32
  }
  func.func @transform_5(%arg0: i32, %arg1: i32) -> (i32, i32, i32) {
    %c0_i32 = arith.constant 0 : i32
    %c0_i32_0 = arith.constant 0 : i32
    %c0_i32_1 = arith.constant 0 : i32
    return %arg1, %c0_i32, %c0_i32_0 : i32, i32, i32
  }
  func.func @transform_6(%arg0: i32, %arg1: i32) -> (i32, i32) {
    %c0_i32 = arith.constant 0 : i32
    %c0_i32_0 = arith.constant 0 : i32
    %c0_i32_1 = arith.constant 0 : i32
    return %c0_i32, %c0_i32_0 : i32, i32
  }
  func.func @transform_7(%arg0: i32, %arg1: i32) -> (i32, i32) {
    %c0_i32 = arith.constant 0 : i32
    %c0_i32_0 = arith.constant 0 : i32
    return %arg0, %c0_i32 : i32, i32
  }
}

</mosaic_0001>

<bundles_post_ra>
// kernel: tpu_custom_call.1
= control target key start
LH: loop header
LB: loop body
LE: loop exit
PB: predicated region body
PF: predicated region fallthrough
CT: control target
= control target key end

     0   :  { %12 = vsyncpa [#allocation8], 0  ;;  %s1056_s24 = smov 0   ;;  %s1058_s25 = smov 0   ;;  %s1189_s0 = inlined_call_operand.vmem [shape: bf16[8,32], index: 0, kind: input, shape index: {}]   ;;  %s1190_s1 = inlined_call_operand.vmem [shape: bf16[8,32], index: 1, kind: input, shape index: {}]   ;;  %s1191_s2 = inlined_call_operand.vmem [shape: bf16[8,32], index: 2, kind: input, shape index: {}]   ;;  %s1192_s3 = inlined_call_operand.vmem [shape: bf16[3,4,32,8], index: 3, kind: input, shape index: {}]   ;;  %s1193_s4 = inlined_call_operand.vmem [shape: f32[3,4,1,8], index: 4, kind: input, shape index: {}]   ;;  %s1194_s5 = inlined_call_operand.vmem [shape: bf16[4,8,32], index: 5, kind: input, shape index: {}]   ;;  %s1195_s6 = inlined_call_operand.vmem [shape: f32[1,32], index: 6, kind: input, shape index: {}]   ;;  %s1196_s7 = inlined_call_operand.hbm [shape: f32[8,32], index: 7, kind: output, shape index: {}]  }
   0x1   :  { %s1060_s26 = smov 0   ;;  %s1062_s27 = smov 0  }
   0x2   :  { %s1064_s28 = smov 0  }
   0x3 LB: > { %s817_s29 = sadd.s32 4294967295, %s1012_s28   ;;  %s27_s30 = sadd.s32 1, %s1008_s27  ;;  %s1012_s28 = sphi %s1064_s28, %s18_s28   ;;  %s1008_s27 = sphi %s1062_s27, %s1201_s27   ;;  %s1004_s26 = sphi %s1060_s26, %s1200_s26   ;;  %s1000_s25 = sphi %s1058_s25, %s1199_s25   ;;  %s996_s24 = sphi %s1056_s24, %s1198_s24  }
   0x4   : > { %p28_p0 = scmp.ge.s32.totalorder %s27_s30, 4  ;;  %p112_p1 = scmp.ne.s32.totalorder %s1000_s25, %s996_s24 }
   0x5   : > { %p113_p2 = scmp.eq.s32.totalorder %s1012_s28, 0  ;;  %s105_s10 = sadd.s32 1, %s1000_s25 }
   0x6   : > { %s1203_s30 = smov (%p28_p0, %s27_s30), 0  ;;  %p820_p5 = scmp.ge.s32.totalorder %s1012_s28, 4 }
   0x7   : > { %p1088_p3 = por %p113_p2, %p112_p1  ;;  %s102_s9 = ssub.s32 %s1008_s27, %s1203_s30 }
   0x8   : > { %p103_p4 = scmp.eq.s32.totalorder %s102_s9, 0  ;;  %253 = sbr.rel (%p820_p5) target bundleno = 30 (0x1e), region = 32 }
   0xa   : > { %s1096_s11 = scalar_select %p103_p4, %s1000_s25, %s105_s10  }
   0xd   : > { %256 = sbr.rel (!%p1088_p3) target bundleno = 23 (0x17), region = 36  ;;  %s258_s12 = sand.u32 (%p1088_p3), 1, %s1000_s25  }
   0xe   : > { %s875_s13 = sshll.u32 (%p1088_p3), %s1008_s27, 4  ;;  %s882_s14 = smul.u32 (%p1088_p3), 48, %s258_s12 }
   0xf   : > { %s263_s17 = scalar_lea.vmem (%p1088_p3), %s1192_s3, %s875_s13 }
  0x10   : > { %v280_v0 = vld [vmem:[%s263_s17] sm:$0xff] (%p1088_p3)   ;;  %v284_v1 = vld [vmem:[%s263_s17 + $0x8] sm:$0xff] (%p1088_p3)   ;;  %s260_s18 = scalar_lea.vmem (%p1088_p3), [#allocation5], %s882_s14 }
  0x11   : > { %v288_v2 = vld [vmem:[%s263_s17 + $0x40] sm:$0xff] (%p1088_p3)   ;;  %281 = vst [vmem:[%s260_s18] sm:$0xff] (%p1088_p3), %v280_v0   ;;  %v292_v3 = vld [vmem:[%s263_s17 + $0x48] sm:$0xff] (%p1088_p3)  }
  0x12   : > { %285 = vst [vmem:[%s260_s18 + $0x8] sm:$0xff] %v284_v1   ;;  %v296_v4 = vld [vmem:[%s263_s17 + $0x80] sm:$0xff]   ;;  %v300_v5 = vld [vmem:[%s263_s17 + $0x88] sm:$0xff]  }
  0x13   : > { %289 = vst [vmem:[%s260_s18 + $0x10] sm:$0xff] %v288_v2  }
  0x14   : > { %293 = vst [vmem:[%s260_s18 + $0x18] sm:$0xff] %v292_v3  }
  0x15   : > { %297 = vst [vmem:[%s260_s18 + $0x20] sm:$0xff] %v296_v4  }
  0x16   : > { %301 = vst [vmem:[%s260_s18 + $0x28] sm:$0xff] %v300_v5  }
  0x17 PF: > { %351 = sbr.rel (!%p1088_p3) target bundleno = 30 (0x1e), region = 77  ;;  %s353_s19 = sand.u32 (%p1088_p3), 1, %s1000_s25  }
  0x18   : > { %s356_s22 = scalar_lea.vmem (%p1088_p3), %s1193_s4, %s1008_s27  ;;  %s883_s23 = smul.u32 (%p1088_p3), 3, %s353_s19 }
  0x19   : > { %v373_v6 = vld [vmem:[%s356_s22] sm:$0x1] (%p1088_p3)  ;;  %v375_v7 = vld [vmem:[%s356_s22 + $0x4] sm:$0x1] (%p1088_p3)  ;;  %v377_v8 = vld [vmem:[%s356_s22 + $0x8] sm:$0x1] (%p1088_p3) }
  0x1a   : > { %s355_s9 = scalar_lea.vmem (%p1088_p3), [#allocation6], %s883_s23 }
  0x1b   : > { %374 = vst [vmem:[%s355_s9] sm:$0x1] (%p1088_p3), %v373_v6 }
  0x1c   : > { %376 = vst [vmem:[%s355_s9 + $0x1] sm:$0x1] %v375_v7 }
  0x1d   : > { %378 = vst [vmem:[%s355_s9 + $0x2] sm:$0x1] %v377_v8 }
  0x1e PF: > { %p823_p6 = scmp.ge.s32.totalorder %s1012_s28, 1  ;;  %p406_p7 = scmp.lt.s32.totalorder %s1012_s28, 5 }
  0x20   : > { %p407_p8 = pnand %p823_p6, %p406_p7 }
  0x21   : > { %s413_s8 = sand.u32 (!%p407_p8), 1, %s996_s24   ;;  %p462_p9 = scmp.lt.s32.totalorder (!%p407_p8), %s1004_s26, 3 }
  0x22   : > { %410 = sbr.rel (%p407_p8) target bundleno = 862 (0x35e), region = 115  ;;  %p825_p10 = scmp.ne.s32.totalorder (!%p407_p8), %s1004_s26, 0 }
  0x23   : > { %s884_s10 = smul.u32 (!%p407_p8), 48, %s413_s8 }
  0x24   : > { %s885_s12 = smul.u32 (!%p407_p8), 3, %s413_s8 }
  0x25   : > { %s1123_s18 = scalar_lea.vmem (!%p407_p8), [#allocation5], %s884_s10 }
  0x26   : > { %s1125_s19 = scalar_lea.vmem (!%p407_p8), [#allocation6], %s885_s12 }
  0x27   : > { %s463_s13 = scalar_select %p462_p9, %s1004_s26, 3 }
  0x28   : > { %470 = sbr.rel (%p825_p10) target bundleno = 47 (0x2f), region = 127 }
  0x29   : > { %s824_s14 = sshll.u32 %s463_s13, 2 }
  0x2a   : > { %s1121_s17 = scalar_lea.vmem %s1194_s5, %s824_s14 }
  0x2d   : > { %vm471_vm0 = vcmask 261120   ;;  %v1014_v9 = vmov 0.0  }
  0x2e   : > { %472 = vst.msk [vmem:[#allocation2] sm:$0xff] %vm471_vm0, %v1014_v9 }
  0x2f PF: > { %v877_v10 = vld [vmem:[%s1123_s18 + $0x18] sm:$0xff]  ;;  %v881_v11 = vld [vmem:[%s1123_s18 + $0x8] sm:$0xff]  ;;  %v876_v12 = vld [vmem:[%s1123_s18 + $0x10] sm:$0xff]  ;;  %vm501_vm1 = vcmask 261120   ;;  %s854_s23 = sshll.u32 %s1004_s26, 2  ;;  %vm559_vm2 = vcmask 60416  }
  0x30   : > { %511 = vmatpush.bf16.msra.mxu0 %v877_v10  ;;  %596 = vmatpush.bf16.msra.mxu2 %v881_v11  ;;  %v880_v13 = vld [vmem:[%s1123_s18] sm:$0xff]  ;;  %v477_v14 = vld [vmem:[%s1190_s1] sm:$0xf]  ;;  %s558_s9 = scalar_lea.vmem [#allocation3], %s854_s23  ;;  %vm611_vm3 = vcmask 64512   ;;  %s563_s12 = scalar_lea.vmem [#allocation4], %s854_s23 }
  0x31   : > { %v565_v15 = vld [vmem:[%s1189_s0] sm:$0xf]  ;;  %v934_v16 = vld [vmem:[%s1125_s19 + $0x1] ss:$0 sm:$0xff]  ;;  %v935_v20 = vld [vmem:[%s1125_s19] ss:$0 sm:$0xff] }
  0x32   : > { %v879_v29 = vld [vmem:[%s1123_s18 + $0x28] sm:$0xff]  ;;  %v878_v30 = vld [vmem:[%s1123_s18 + $0x20] sm:$0xff]  ;;  %vm646_vm4 = vcmask 1043456   ;;  %p870_p11 = scmp.ne.s32.totalorder %s1004_s26, 3 }
  0x33   : > { %549 = vmatpush.bf16.msra.mxu1 %v879_v29  ;;  %v478_v31 = vld [vmem:[%s1191_s2] sm:$0xf]  ;;  %v936_v35 = vld [vmem:[%s1125_s19 + $0x2] ss:$0 sm:$0xff] }
  0x34   : > { %512 = vmatpush.bf16.msra.mxu0 %v876_v12  ;;  %597 = vmatpush.bf16.msra.mxu2 %v880_v13  ;;  %v665_v47 = vld [vmem:[%s1121_s17] sm:$0xf] }
  0x35   : > { %v670_v48 = vsel %vm646_vm4, %v665_v47, 0  ;;  %v663_v56 = vld [vmem:[#allocation2] sm:$0xff] }
  0x37   : > { %839 = vmatmul.msk.bf16.vlgmr.msra.gmra.mxu0 %vm501_vm1, %v477_v14  ;;  %864 = vmatmul.msk.bf16.vlgmr.msra.gmra.mxu2 %vm501_vm1, %v565_v15 }
  0x38   : > { %550 = vmatpush.bf16.msra.mxu1 %v878_v30 }
  0x3b   : > { %853 = vmatmul.msk.bf16.vlgmr.msra.gmra.mxu1 %vm501_vm1, %v478_v31 }
  0x3c   : > { %679 = vmatpush.bf16.msrb.mxu1 %v670_v48 }
  0xb4   : > { %v514_v17 = vpop.f32.mrf.mxu0 }
  0xb5   : > { %v515_v18 = vadd.f32 %v934_v16, %v514_v17 }
  0xb7   : > { %v556_v19 = vpack.c.bf16 %v515_v18, %v515_v18 }
  0xb8   : > { %v552_v36 = vpop.f32.mrf.mxu1 }
  0xb9   : > { %560 = vst.msk [vmem:[%s558_s9] sm:$0xf] %vm559_vm2, %v556_v19  ;;  %v553_v37 = vadd.f32 %v936_v35, %v552_v36 }
  0xba   : > { %v599_v21 = vpop.f32.mrf.mxu2 }
  0xbb   : > { %v600_v23 = vadd.f32 %v935_v20, %v599_v21  ;;  %v561_v38 = vpack.c.bf16 %v553_v37, %v553_v37 }
  0xbc   : > { %v516_v22 = vpop.f32.mrf.mxu0 }
  0xbd   : > { %v603_v25 = vmul.f32 0.35355338, %v600_v23  ;;  %564 = vst.msk [vmem:[%s563_s12] sm:$0xf] %vm559_vm2, %v561_v38 }
  0xbf   : > { %v604_v28 = vpack.c.bf16 %v603_v25, %v603_v25 }
  0xc0   : > { %v607_v24 = vld [vmem:[%s558_s9] sm:$0xf]  ;;  %v554_v41 = vpop.f32.mrf.mxu1 }
  0xc1   : > { %v616_v26 = vsel %vm611_vm3, %v607_v24, 0 }
  0xc2   : > { %v601_v27 = vpop.f32.mrf.mxu2  ;;  %625 = vmatpush.bf16.xpose.msra.mxu3 %v616_v26 }
  0xc4   : > { %v610_v43 = vld [vmem:[%s563_s12] sm:$0xf] }
  0xc5   : > { %v648_v44 = vsel %vm646_vm4, %v610_v43, 0 }
  0xc6   : > { %657 = vmatpush.bf16.msrb.mxu0 %v648_v44 }
  0xc9   : > { %867 = vmatmul.msk.bf16.vlgmr.msra.gmra.mxu3 %vm611_vm3, %v604_v28 }
 0x14c   : > { %v627_v32 = vpop.f32.mrf.mxu3 }
 0x14d   : > { %v631_v33 = vsel %vm611_vm3, %v627_v32, -inf }
 0x14e   : > { %632 = vmax.xlane.f32.xlu0 %v631_v33 }
 0x154   : > { %v629_v34 = vpop.f32.mrf.mxu3 }
 0x1c1   : > { %v633_v39 = vpop.xlane.xlu0 %632 }
 0x1c2   : > { %v634_v40 = vsub.f32 %v627_v32, %v633_v39 }
 0x1c4   : > { %v635_v42 = vmul.f32 1.442695, %v634_v40 }
 0x1c6   : > { %937 = vpow2.f32 %v635_v42 }
 0x1cc   : > { %v938_v45 = vpop.eup %937 }
 0x1cd   : > { %v637_v46 = vsel %vm611_vm3, %v938_v45, 0.0 }
 0x1ce   : > { %638 = vadd.xlane.f32.xlu0 %v637_v46 }
 0x241   : > { %v639_v49 = vpop.xlane.xlu0 %638 }
 0x242   : > { %939 = vrcp.f32 %v639_v49 }
 0x248   : > { %v940_v50 = vpop.eup %939 }
 0x249   : > { %v641_v51 = vmul.f32 %v940_v50, %v938_v45 }
 0x24b   : > { %v642_v52 = vpack.c.bf16 %v641_v51, %v641_v51 }
 0x24d   : > { %868 = vmatmul.msk.bf16.vlgmr.msrb.gmra.mxu0 %vm611_vm3, %v642_v52 }
 0x2ca   : > { %v659_v53 = vpop.f32.mrf.mxu0 }
 0x2cb   : > { %v664_v54 = vpack.c.bf16 %v659_v53, %v659_v53 }
 0x2cd   : > { %869 = vmatmul.msk.bf16.vlgmr.msrb.gmra.mxu1 %vm611_vm3, %v664_v54 }
 0x2d2   : > { %v661_v55 = vpop.f32.mrf.mxu0 }
 0x34a   : > { %v681_v57 = vpop.f32.mrf.mxu1 }
 0x34b   : > { %v685_v58 = vadd.f32 %v681_v57, %v663_v56 }
 0x34d   : > { %686 = vst.msk [vmem:[#allocation2] sm:$0xff] %vm501_vm1, %v685_v58 }
 0x34e   : > { %690 = sbr.rel (%p870_p11) target bundleno = 856 (0x358), region = 135 }
 0x352   : > { %v683_v59 = vpop.f32.mrf.mxu1 }
 0x353   : > { %v941_v61 = vld [vmem:[%s1195_s6] ss:$0 sm:$0xff] }
 0x354   : > { %v691_v60 = vld [vmem:[#allocation2] sm:$0xff] }
 0x355   : > { %v696_v62 = vadd.f32 %v941_v61, %v691_v60 }
 0x357   : > { %697 = vst.msk [vmem:[#allocation7] sm:$0xff] %vm501_vm1, %v696_v62 }
 0x358 PF: > { %p890_p12 = scmp.eq.s32.totalorder %s817_s29, 3  ;;  %s708_s17 = sshll.u32 %s1196_s7, 4  ;;  %s709_s17 = int_to_ptr.hbm [resolvable:$true] %s708_s17 }
 0x359   : > { %s1015_s18 = smov [#allocation7]  }
 0x35a   : > { %s706_s19 = sshll.u32 %s1015_s18, 4  ;;  %s707_s19 = int_to_ptr.vmem [resolvable:$true] %s706_s19 }
 0x35b   : > { %887 = dma.vmem_to_hbm [thread:$0]  (%p890_p12), %s707_s19, 128, %s709_s17, [#allocation8]  }
 0x35c   : > { %991 = dma.done.wait (%p890_p12), [#allocation8], 128  }
 0x35d   : > { %993 = vsyncadd (%p890_p12), [#allocation8], 4294967168 }
 0x35e PF: > { %s18_s28 = sadd.s32 1, %s1012_s28   ;;  %s1198_s24 = smov %s1000_s25 }
 0x35f   : > { %p15_p13 = scmp.ge.s32.totalorder %s18_s28, 6   ;;  %s1199_s25 = smov %s1096_s11 }
 0x360   : > { %s1200_s26 = smov %s1008_s27  ;;  %s1201_s27 = smov %s1203_s30 }
 0x361   :  { %17 = sbr.rel (!%p15_p13) target bundleno = 3 (0x3), region = 190 }
 0x366   :  { %722 = vsyncpa [#allocation8], 1 }
 0x367   :  { %724 = vsyncpa [#allocation8 + $0x1], 1 }

</bundles_post_ra>
